<compile_context>
chip_gen: v7x
topology: tpu7x:2x2x1
jax: 0.10.0
libtpu: 0.0.40
codegen_flags: <defaults>
</compile_context>

<pallas_src>
import jax
import jax.numpy as jnp
from jax.experimental import pallas as pl
from jax.experimental.pallas import tpu as pltpu


# ----------------------------------------------------------------------------
# kernels
# ----------------------------------------------------------------------------
def _fused_matmul_kernel(x_ref, w_ref, g_ref, o_ref):
    # x_ref: (TB, J*Z) batch chunk; w_ref: (J*Z, IZp) resident fused weight;
    # g_ref: (1, IZp) resident fused bias row; o_ref: (TB, IZp).
    acc = jnp.dot(x_ref[...], w_ref[...], preferred_element_type=jnp.float32)
    o_ref[...] = (acc + g_ref[...]).astype(o_ref.dtype)


def _blockmix_kernel(a_ref, b_ref, g_ref, x_ref, o_ref):
    # a_ref, b_ref: (I, J) f32 in SMEM; g_ref: (I,) f32 in SMEM
    # x_ref: (TB, J, Z); o_ref: (TB, I, Z)
    tb, n_j, z = x_ref.shape
    n_i = o_ref.shape[1]
    xj = [x_ref[:, j, :].astype(jnp.float32) for j in range(n_j)]   # (TB, Z) each
    sj = [jnp.sum(v, axis=-1, keepdims=True) for v in xj]           # (TB, 1) each
    for i in range(n_i):
        t2 = g_ref[i] + jnp.zeros((tb, 1), jnp.float32)             # gamma + beta-term
        for j in range(n_j):
            t2 = t2 + b_ref[i, j] * sj[j]
        t1 = jnp.zeros((tb, z), jnp.float32)                        # alpha-term
        for j in range(n_j):
            t1 = t1 + a_ref[i, j] * xj[j]
        o_ref[:, i, :] = (t1 + t2).astype(o_ref.dtype)


# ----------------------------------------------------------------------------
# tiling heuristics
# ----------------------------------------------------------------------------
def _round_up(v, m):
    return ((v + m - 1) // m) * m


def _sublane_pack(dtype):
    itemsize = jnp.dtype(dtype).itemsize
    return max(8, 32 // max(itemsize, 1))   # f32 -> 8, bf16 -> 16, int8/fp8 -> 32


def _tpu_target():
    """Generation-aware tiling targets (trace-time Python only)."""
    kind = ""
    try:
        kind = jax.devices()[0].device_kind.lower()
    except Exception:
        pass
    vmem_cap = None
    try:
        vmem_cap = int(pltpu.get_tpu_info().vmem_capacity_bytes)
    except Exception:
        pass
    if "v7" in kind:        # 2 TC/chip, ~3.2 TB/s HBM, 64 MiB VMEM/TC
        n_tc, tile_bytes, default_vmem = 2, 4 << 20, 64 << 20
    elif "v6" in kind:      # 1 TC, ~1.4 TB/s, 128 MiB VMEM
        n_tc, tile_bytes, default_vmem = 1, 2 << 20, 128 << 20
    elif "v5" in kind:      # 1 TC, ~0.8 TB/s, 128 MiB VMEM
        n_tc, tile_bytes, default_vmem = 1, 1 << 20, 128 << 20
    else:
        n_tc, tile_bytes, default_vmem = 1, 2 << 20, 64 << 20
    if vmem_cap is None:
        vmem_cap = default_vmem
    return {
        "n_tc": n_tc,
        "tile_bytes": tile_bytes,              # target HBM traffic per grid step
        "vmem_budget": int(vmem_cap * 0.6),    # leave headroom for internal scratch
    }


def _choose_tb(B, row_bytes, pack, tgt, resident_bytes):
    """Batch-chunk size: big enough for >= tile_bytes HBM traffic per step,
    capped by VMEM, sublane-pack aligned; splits only on multi-TC chips."""
    io_budget = max(tgt["vmem_budget"] - 2 * resident_bytes, 1 << 20)
    tb_cap = max(io_budget // (2 * row_bytes), pack)     # 2x: double-buffered in+out
    tb = max(tgt["tile_bytes"] // row_bytes, pack)
    tb = min(tb, tb_cap)
    tb = max((tb // pack) * pack, pack)
    if tgt["n_tc"] > 1 and B > pack:
        # give every TensorCore at least one block
        tb = min(tb, _round_up(pl.cdiv(B, tgt["n_tc"]), pack))
    if tb >= B:
        return B                 # single full block (1-TC chips / small batches)
    nb = pl.cdiv(B, tb)
    if tgt["n_tc"] > 1 and nb < 8 and nb % tgt["n_tc"] != 0:
        nb = _round_up(nb, tgt["n_tc"])     # avoid ~50% core imbalance at small nb
        tb = max(_round_up(pl.cdiv(B, nb), pack), pack)
    return tb


# ----------------------------------------------------------------------------
# pallas_call wrappers
# ----------------------------------------------------------------------------
def _fused_path(x2, w, g, B, JZ, IZp, dtype, tgt):
    itemsize = jnp.dtype(dtype).itemsize
    pack = _sublane_pack(dtype)
    row_bytes = (JZ + IZp) * itemsize
    resident_bytes = (JZ * IZp + IZp) * itemsize
    TB = _choose_tb(B, row_bytes, pack, tgt, resident_bytes)
    nb = pl.cdiv(B, TB)
    # TB-derived scoped-VMEM limit: double-buffered I/O blocks + resident W/g
    # (counted x2 in case the constant-index_map specs still get two buffers).
    vmem_limit = int(min(128 << 20,
                         2 * TB * row_bytes + 2 * resident_bytes + (8 << 20)))
    cost = pl.CostEstimate(
        flops=2 * B * JZ * IZp,
        transcendentals=0,
        bytes_accessed=itemsize * (B * JZ + B * IZp + JZ * IZp + IZp),
    )
    return pl.pallas_call(
        _fused_matmul_kernel,
        out_shape=jax.ShapeDtypeStruct((B, IZp), dtype),
        grid_spec=pltpu.PrefetchScalarGridSpec(
            num_scalar_prefetch=0,
            grid=(nb,),
            in_specs=[
                pl.BlockSpec((TB, JZ), lambda i: (i, 0)),     # batch chunk
                pl.BlockSpec((JZ, IZp), lambda i: (0, 0)),    # resident fused weight
                pl.BlockSpec((1, IZp), lambda i: (0, 0)),     # resident fused bias
            ],
            out_specs=pl.BlockSpec((TB, IZp), lambda i: (i, 0)),
        ),
        compiler_params=pltpu.CompilerParams(
            dimension_semantics=("parallel",),
            vmem_limit_bytes=vmem_limit,
        ),
        cost_estimate=cost,
    )(x2, w, g)


def _blockmix_path(x3, a32, b32, g32, B, I, J, Z, dtype, tgt):
    itemsize = jnp.dtype(dtype).itemsize
    pack = _sublane_pack(dtype)
    row_bytes = (J * Z + I * Z) * itemsize
    TB = _choose_tb(B, row_bytes, pack, tgt, resident_bytes=0)
    nb = pl.cdiv(B, TB)
    vmem_limit = int(min(128 << 20, 2 * TB * row_bytes + (8 << 20)))
    cost = pl.CostEstimate(
        flops=2 * B * I * J * Z + 2 * B * I * J + B * J * Z,
        transcendentals=0,
        bytes_accessed=itemsize * (B * J * Z + B * I * Z) + 4 * (2 * I * J + I),
    )
    smem_spec = pl.BlockSpec(memory_space=pltpu.MemorySpace.SMEM)
    return pl.pallas_call(
        _blockmix_kernel,
        out_shape=jax.ShapeDtypeStruct((B, I, Z), dtype),
        grid_spec=pltpu.PrefetchScalarGridSpec(
            num_scalar_prefetch=0,
            grid=(nb,),
            in_specs=[
                smem_spec, smem_spec, smem_spec,                  # alpha, beta, gamma
                pl.BlockSpec((TB, J, Z), lambda i: (i, 0, 0)),    # batch chunk
            ],
            out_specs=pl.BlockSpec((TB, I, Z), lambda i: (i, 0, 0)),
        ),
        compiler_params=pltpu.CompilerParams(
            dimension_semantics=("parallel",),
            vmem_limit_bytes=vmem_limit,
        ),
        cost_estimate=cost,
    )(a32, b32, g32, x3)


# ----------------------------------------------------------------------------
# public wrapper
# ----------------------------------------------------------------------------
def _deepset_layer(x, alpha, beta, gamma=None, *, impl=None, pad_out_lanes=None):
    """x: (..., J, Z); alpha/beta: (I, J); gamma: (I,) or None."""
    *batch_dims, J, Z = x.shape
    I = alpha.shape[0]
    B = 1
    for d in batch_dims:
        B *= d
    dtype = x.dtype
    itemsize = jnp.dtype(dtype).itemsize
    tgt = _tpu_target()

    JZ, IZ = J * Z, I * Z
    if pad_out_lanes is None:
        # Lane-dense output slab only when the trailing slice back to IZ lanes
        # is cheap; for large B that extra HBM pass outweighs the masked-store
        # savings inside the kernel.
        pad_out_lanes = (IZ % 128 != 0) and (B * _round_up(IZ, 128) * itemsize <= (4 << 20))
    IZp = _round_up(IZ, 128) if pad_out_lanes else IZ

    fused_w_bytes = JZ * IZp * itemsize
    if impl is None:
        # Size guard: the fused W costs Z-times redundant FLOPs and must stay
        # VMEM-resident, so only take that path while it is clearly HBM-bound.
        use_fused = (Z < 128) and (fused_w_bytes <= (2 << 20))
    elif impl == "fused":
        use_fused = True
    elif impl == "blockmix":
        use_fused = False
    else:
        raise ValueError(f"unknown impl: {impl!r}")

    if use_fused:
        # W[(j,z'),(i,z)] = alpha[i,j]*delta(z,z') + beta[i,j];  g[(i,z)] = gamma[i]
        # (tiny, O(I*J*Z^2); fuses into the jitted program — hoist it out if
        #  alpha/beta/gamma are static across calls)
        eye = jnp.eye(Z, dtype=jnp.float32)
        w = (alpha.astype(jnp.float32).T[:, None, :, None] * eye[None, :, None, :]
             + beta.astype(jnp.float32).T[:, None, :, None])          # (J, Z, I, Z)
        w = w.reshape(JZ, IZ)
        if gamma is None:
            g = jnp.zeros((1, IZ), jnp.float32)
        else:
            g = jnp.broadcast_to(gamma.astype(jnp.float32)[:, None], (I, Z)).reshape(1, IZ)
        if IZp != IZ:
            w = jnp.pad(w, ((0, 0), (0, IZp - IZ)))
            g = jnp.pad(g, ((0, 0), (0, IZp - IZ)))
        w = w.astype(dtype)
        g = g.astype(dtype)

        x2 = x.reshape(B, JZ)            # contiguous reshape, no transpose
        out2 = _fused_path(x2, w, g, B, JZ, IZp, dtype, tgt)
        if IZp != IZ:
            out2 = out2[:, :IZ]          # cheap here by construction (small B)
        return out2.reshape(*batch_dims, I, Z)

    # Fallback: inherent-FLOP path (Z stays in the lane dim, alpha/beta/gamma
    # as SMEM scalars).  Generates I*J static FMAs — fine for the small block
    # counts DeepSetLayer is used with.
    a32 = alpha.astype(jnp.float32)
    b32 = beta.astype(jnp.float32)
    g32 = jnp.zeros((I,), jnp.float32) if gamma is None else gamma.astype(jnp.float32)
    x3 = x.reshape(B, J, Z)
    out3 = _blockmix_path(x3, a32, b32, g32, B, I, J, Z, dtype, tgt)
    return out3.reshape(*batch_dims, I, Z)


deepset_layer = jax.jit(_deepset_layer, static_argnames=("impl", "pad_out_lanes"))


# ----------------------------------------------------------------------------
# reference + self-test
# ----------------------------------------------------------------------------
def _reference(x, alpha, beta, gamma):
    hp = jax.lax.Precision.HIGHEST
    out = jnp.einsum('...jz,ij->...iz', x, alpha, precision=hp)
    out = out + jnp.einsum('...jz,ij->...iz',
                           jnp.sum(x, axis=-1)[..., None], beta, precision=hp)
    if gamma is not None:
        out = out + gamma[..., None]
    return out


if __name__ == "__main__":
    # Deterministic parameter init mirroring the PyTorch __init__:
    #   uniform on [-lim, lim], lim = in_blocks ** -0.5 / 2
    in_blocks, out_blocks = 4, 6
    B, Z = 2, 16
    lim = in_blocks ** (-0.5) / 2.0

    key = jax.random.PRNGKey(0)
    k_x, k_a, k_b, k_g, k_big = jax.random.split(key, 5)

    x = jax.random.normal(k_x, (B, in_blocks, Z), dtype=jnp.float32)
    alpha = jax.random.uniform(k_a, (out_blocks, in_blocks),
                               minval=-lim, maxval=lim, dtype=jnp.float32)
    beta = jax.random.uniform(k_b, (out_blocks, in_blocks),
                              minval=-lim, maxval=lim, dtype=jnp.float32)
    gamma = jax.random.uniform(k_g, (out_blocks,),
                               minval=-lim, maxval=lim, dtype=jnp.float32)

    ref = _reference(x, alpha, beta, gamma)

    # default path (fused matmul; lane-padded output at this small B)
    out = jax.block_until_ready(deepset_layer(x, alpha, beta, gamma))
    assert out.shape == (B, out_blocks, Z)
    assert jnp.allclose(out, ref, atol=1e-5, rtol=1e-5), "fused mismatch"

    # use_bias=False path
    out_nb = jax.block_until_ready(deepset_layer(x, alpha, beta, None))
    assert jnp.allclose(out_nb, _reference(x, alpha, beta, None),
                        atol=1e-5, rtol=1e-5), "fused (no bias) mismatch"

    # unpadded-output variant of the fused kernel
    out_up = jax.block_until_ready(
        deepset_layer(x, alpha, beta, gamma, pad_out_lanes=False))
    assert jnp.allclose(out_up, ref, atol=1e-5, rtol=1e-5), "fused (unpadded) mismatch"

    # large-Z fallback kernel, forced at the same small shapes
    out_bm = jax.block_until_ready(
        deepset_layer(x, alpha, beta, gamma, impl="blockmix"))
    assert jnp.allclose(out_bm, ref, atol=1e-5, rtol=1e-5), "blockmix mismatch"

    # larger batch: multi-block grid, partial last block, generation-aware TB
    B_big = 12000
    x_big = jax.random.normal(k_big, (B_big, in_blocks, Z), dtype=jnp.float32)
    out_big = jax.block_until_ready(deepset_layer(x_big, alpha, beta, gamma))
    ref_big = _reference(x_big, alpha, beta, gamma)
    assert jnp.allclose(out_big, ref_big, atol=1e-4, rtol=1e-4), "large-batch mismatch"

    print("KERNEL_OK")
</pallas_src>

<mosaic_0001>
module attributes {stable_mosaic.version = 11 : i64} {
  func.func @_fused_matmul_kernel(%arg0: i32, %arg1: memref<2x64xf32, #tpu.memory_space<vmem>>, %arg2: memref<64x128xf32, #tpu.memory_space<vmem>>, %arg3: memref<1x128xf32, #tpu.memory_space<vmem>>, %arg4: memref<2x128xf32, #tpu.memory_space<vmem>>) attributes {dimension_semantics = [#tpu.dimension_semantics<parallel>], iteration_bounds = array<i64: 1>, scalar_prefetch = 0 : i64, scratch_operands = 0 : i64, tpu.core_type = #tpu.core_type<tc>, window_params = [{transform_indices = @transform_0, window_bounds = array<i64: 2, 64>}, {pipeline_mode = #tpu.pipeline_mode<synchronous>, transform_indices = @transform_1, window_bounds = array<i64: 64, 128>}, {pipeline_mode = #tpu.pipeline_mode<synchronous>, transform_indices = @transform_2, window_bounds = array<i64: 1, 128>}, {transform_indices = @transform_3, window_bounds = array<i64: 2, 128>}]} {
    %c0 = arith.constant 0 : index
    %c0_0 = arith.constant 0 : index
    %0 = vector.load %arg1[%c0, %c0_0] : memref<2x64xf32, #tpu.memory_space<vmem>>, vector<2x64xf32>
    %c0_1 = arith.constant 0 : index
    %c0_2 = arith.constant 0 : index
    %1 = vector.load %arg2[%c0_1, %c0_2] : memref<64x128xf32, #tpu.memory_space<vmem>>, vector<64x128xf32>
    %cst = arith.constant dense<0.000000e+00> : vector<2x128xf32>
    %2 = tpu.matmul %0, %1, %cst {dimension_numbers = #tpu.dot_dimension_numbers<[1], [0], [0], [1], [0, 0, 1, 1], [], []>} : vector<2x64xf32>, vector<64x128xf32>, vector<2x128xf32> -> vector<2x128xf32>
    %c0_3 = arith.constant 0 : index
    %c0_4 = arith.constant 0 : index
    %3 = vector.load %arg3[%c0_3, %c0_4] : memref<1x128xf32, #tpu.memory_space<vmem>>, vector<1x128xf32>
    %4 = vector.broadcast %3 : vector<1x128xf32> to vector<2x128xf32>
    %5 = arith.addf %2, %4 : vector<2x128xf32>
    %c0_5 = arith.constant 0 : index
    %c0_6 = arith.constant 0 : index
    %6 = vector.load %arg4[%c0_5, %c0_6] : memref<2x128xf32, #tpu.memory_space<vmem>>, vector<2x128xf32>
    tpu.vector_store %arg4[%c0_5, %c0_6], %5 {strides = array<i32>} : memref<2x128xf32, #tpu.memory_space<vmem>>, vector<2x128xf32>,
    return
  }
  func.func @transform_0(%arg0: i32) -> (i32, i32) {
    %c0_i32 = arith.constant 0 : i32
    %c0_i32_0 = arith.constant 0 : i32
    return %arg0, %c0_i32 : i32, i32
  }
  func.func @transform_1(%arg0: i32) -> (i32, i32) {
    %c0_i32 = arith.constant 0 : i32
    %c0_i32_0 = arith.constant 0 : i32
    %c0_i32_1 = arith.constant 0 : i32
    return %c0_i32, %c0_i32_0 : i32, i32
  }
  func.func @transform_2(%arg0: i32) -> (i32, i32) {
    %c0_i32 = arith.constant 0 : i32
    %c0_i32_0 = arith.constant 0 : i32
    %c0_i32_1 = arith.constant 0 : i32
    return %c0_i32, %c0_i32_0 : i32, i32
  }
  func.func @transform_3(%arg0: i32) -> (i32, i32) {
    %c0_i32 = arith.constant 0 : i32
    %c0_i32_0 = arith.constant 0 : i32
    return %arg0, %c0_i32 : i32, i32
  }
}

</mosaic_0001>

<bundles_post_ra>
// kernel: _deepset_layer.1
= control target key start
LH: loop header
LB: loop body
LE: loop exit
PB: predicated region body
PF: predicated region fallthrough
CT: control target
= control target key end

     0   :  { %v154_v0 = vmov 0.0|0.0   ;;  %vm155_vm0 = vmmov 0   ;;  %v156_v4 = vmov 0.0   ;;  %vm30_vm1 = vcmask 523264   ;;  %s210_s1 = inlined_call_operand.vmem [shape: f32[64,128], index: 1, kind: input, shape index: {}]   ;;  %s211_s0 = inlined_call_operand.vmem [shape: f32[2,64], index: 0, kind: input, shape index: {}]   ;;  %s212_s2 = inlined_call_operand.vmem [shape: f32[1,128], index: 2, kind: input, shape index: {}]   ;;  %s213_s3 = inlined_call_operand.vmem [shape: f32[2,128], index: 3, kind: output, shape index: {}]  }
   0x1   :  { %139 = vmatprep.subr.bf16.mxu0 %v154_v0  ;;  %v15_v1 = vld [vmem:[%s210_s1] sm:$0xff]  ;;  %v16_v2 = vld [vmem:[%s210_s1 + $0x8] sm:$0xff]  ;;  %v17_v3 = vld [vmem:[%s210_s1 + $0x10] sm:$0xff]  ;;  %136 = vmatprep.mubr.msk.f32.mxu0 %vm155_vm0, %v156_v4 }
   0x2   :  { %v140_v5 = vpack.c.bf16 %v16_v2, %v15_v1  ;;  %v18_v6 = vld [vmem:[%s210_s1 + $0x18] sm:$0xff]  ;;  %v19_v8 = vld [vmem:[%s210_s1 + $0x20] sm:$0xff]  ;;  %v20_v9 = vld [vmem:[%s210_s1 + $0x28] sm:$0xff] }
   0x3   :  { %v143_v7 = vpack.c.bf16 %v18_v6, %v17_v3  ;;  %v146_v10 = vpack.c.bf16 %v20_v9, %v19_v8  ;;  %v21_v11 = vld [vmem:[%s210_s1 + $0x30] sm:$0xff]  ;;  %v22_v12 = vld [vmem:[%s210_s1 + $0x38] sm:$0xff]  ;;  %v14_v14 = vld [vmem:[%s211_s0] sm:$0x3] }
   0x4   :  { %141 = vmatpush3.bf16.msra.mxu0 %v140_v5  ;;  %v149_v13 = vpack.c.bf16 %v22_v12, %v21_v11  ;;  %v109_v15 = vld [vmem:[%s212_s2] ss:$0 sm:$0xff] }
   0x5   :  { %142 = vmatprep.subr.bf16.mxu0 %v154_v0 }
   0x8   :  { %144 = vmatpush3.bf16.msra.mxu0 %v143_v7 }
   0x9   :  { %145 = vmatprep.subr.bf16.mxu0 %v154_v0 }
   0xc   :  { %147 = vmatpush3.bf16.msra.mxu0 %v146_v10 }
   0xd   :  { %148 = vmatprep.subr.bf16.mxu0 %v154_v0 }
  0x10   :  { %150 = vmatpush3.bf16.msra.mxu0 %v149_v13 }
  0x13   :  { %137 = vmatmul.mubr.msk.f32.vlgmr.msra.gmra.mrb[0].mxu0 %vm30_vm1, %v14_v14 }
  0xe6   :  { %v100_v16 = vpop.f32.mrb[0].mxu0 }
  0xe7   :  { %v101_v17 = vadd.f32 %v109_v15, %v100_v16  ;;  %v138_v18 = vpop.f32.mrb[1].mxu0 }
  0xe9   :  { %104 = vst [vmem:[%s213_s3] sm:$0x3] %v101_v17 }

</bundles_post_ra>
